<compile_context>
chip_gen: v6e
topology: v6e:2x2x1
jax: 0.10.0
libtpu: 0.0.40
codegen_flags: <defaults>
</compile_context>

<pallas_src>
import functools

import jax
import jax.numpy as jnp
from jax.experimental import pallas as pl
from jax.experimental.pallas import tpu as pltpu

# Keep the XLA-side reference convs / tiny glue matmuls in full f32 so the
# numerical comparison against the Pallas path is tight.
jax.config.update("jax_default_matmul_precision", "highest")


def _dw_conv_stats_kernel(H, W, x_ref, w_ref, m_ref, y_ref, s1_ref, g_ref):
    """Depthwise 3x3 conv (stride 1, pad 1) + per-batch statistics.

    x_ref : (1, C, HW)  one batch element, channel-major (HW on the lane axis)
    w_ref : (9, C, 1)   depthwise weights, one (C, 1) column per tap
    m_ref : (9, 1, HW)  precomputed 0/1 border masks per tap
    y_ref : (1, C, HW)  conv output (lane-dense store)
    s1_ref: (1, C, 1)   per-batch  sum_p y[c, p]
    g_ref : (1, C, C)   per-batch  sum_p y[c, p] * y[c', p]   (Gram)
    """
    HW = H * W
    x = x_ref[0]                                    # (C, HW)

    # Center tap (dh=0, dw=0): no shift, no border mask needed.
    acc = x * w_ref[4]

    # Remaining 8 taps: XLU lane rotation + masked per-channel FMA on the VPU.
    # out[c, p] += w[c, tap] * x[c, p + dh*W + dw]  (zero outside the image)
    for dh in (-1, 0, 1):
        for dw in (-1, 0, 1):
            if dh == 0 and dw == 0:
                continue
            tap = (dh + 1) * 3 + (dw + 1)
            shift = (-(dh * W + dw)) % HW           # roll so out[p] sees x[p + dh*W + dw]
            shifted = pltpu.roll(x, shift=shift, axis=1)
            acc = acc + shifted * w_ref[tap] * m_ref[tap]

    y_ref[0] = acc                                  # lane-dense (C, HW) store
    s1_ref[0] = jnp.sum(acc, axis=1, keepdims=True)
    # Gram via transposed contraction: the MXU absorbs the transpose (no XLU).
    g_ref[0] = jax.lax.dot_general(
        acc, acc, dimension_numbers=(((1,), (1,)), ((), ())),
        preferred_element_type=jnp.float32)


def _pw_conv_kernel(y_ref, w2_ref, b2_ref, o_ref):
    """Fused dw_bn -> pointwise 1x1 conv -> pw_bn: one matmul + bias per batch.

    y_ref : (N, C, HW)  depthwise conv output (channel-major)
    w2_ref: (O, C)      folded weight = diag(pw_scale) @ Wp @ diag(dw_scale)
    b2_ref: (O, 1)      folded bias
    o_ref : (N, O, HW)  final output (lane-dense)
    """
    w2 = w2_ref[...]
    b2 = b2_ref[...]
    # Static unroll keeps w2 resident across all batches; at production
    # N / HW this becomes a parallel grid over N with >=512-lane HW tiles.
    for n in range(y_ref.shape[0]):
        o_ref[n] = jnp.dot(w2, y_ref[n], preferred_element_type=jnp.float32) + b2


def separable_conv2d(x_nchw, w_dw_oihw, w_pw_oihw, eps=1e-5):
    """Forward of Separabel_conv2d (training-mode BN, gamma=1, beta=0).

    x_nchw   : (N, C, H, W)
    w_dw_oihw: (C, 1, 3, 3)   depthwise conv weight (groups == C)
    w_pw_oihw: (O, C, 1, 1)   pointwise conv weight
    Returns  : (N, O, H, W)
    """
    N, C, H, W = x_nchw.shape
    O = w_pw_oihw.shape[0]
    KH, KW = w_dw_oihw.shape[2], w_dw_oihw.shape[3]
    assert (KH, KW) == (3, 3), "kernel specialized to the module's 3x3 default"
    HW = H * W

    # Channel-major view: NCHW -> (N, C, HW) is a free, layout-preserving
    # reshape.  No transpose of any activation tensor anywhere.
    x_flat = x_nchw.reshape(N, C, HW).astype(jnp.float32)
    # Depthwise weights: one (C, 1) column per tap, tap index = kh*3 + kw.
    w_taps = jnp.transpose(
        w_dw_oihw[:, 0].reshape(C, KH * KW)).reshape(KH * KW, C, 1)
    w_taps = w_taps.astype(jnp.float32)
    w_pw = w_pw_oihw[:, :, 0, 0].astype(jnp.float32)            # (O, C)

    # Precomputed 0/1 border masks per tap (tiny; constant-folded under jit).
    hh = jnp.arange(H)
    ww = jnp.arange(W)
    masks = []
    for dh in (-1, 0, 1):
        for dw in (-1, 0, 1):
            mh = (hh + dh >= 0) & (hh + dh < H)
            mw = (ww + dw >= 0) & (ww + dw < W)
            masks.append((mh[:, None] & mw[None, :]).reshape(1, HW))
    mask9 = jnp.stack(masks).astype(jnp.float32)                # (9, 1, HW)

    # ---- Kernel 1: depthwise conv + per-batch partial statistics -----------
    kernel1 = functools.partial(_dw_conv_stats_kernel, H, W)
    y, s1, gram = pl.pallas_call(
        kernel1,
        out_shape=(jax.ShapeDtypeStruct((N, C, HW), jnp.float32),
                   jax.ShapeDtypeStruct((N, C, 1), jnp.float32),
                   jax.ShapeDtypeStruct((N, C, C), jnp.float32)),
        grid_spec=pltpu.PrefetchScalarGridSpec(
            num_scalar_prefetch=0, grid=(N,),
            in_specs=[pl.BlockSpec((1, C, HW), lambda n: (n, 0, 0)),
                      pl.BlockSpec((KH * KW, C, 1), lambda n: (0, 0, 0)),
                      pl.BlockSpec((KH * KW, 1, HW), lambda n: (0, 0, 0))],
            out_specs=[pl.BlockSpec((1, C, HW), lambda n: (n, 0, 0)),
                       pl.BlockSpec((1, C, 1), lambda n: (n, 0, 0)),
                       pl.BlockSpec((1, C, C), lambda n: (n, 0, 0))]),
        compiler_params=pltpu.CompilerParams(
            dimension_semantics=("parallel",)),
    )(x_flat, w_taps, mask9)

    # ---- tiny scalar glue: fold both BatchNorms into the 1x1 conv ----------
    m = float(N * HW)
    mean_y = jnp.sum(s1[:, :, 0], axis=0) / m                   # (C,)
    eyy = jnp.sum(gram, axis=0) / m                             # (C, C)
    cov_y = eyy - jnp.outer(mean_y, mean_y)                     # biased covariance
    # NOTE: single-pass covariance E[yy^T]-E[y]E[y]^T can lose precision for
    # large-mean activations; a centered two-pass variant costs one extra pass.
    a = 1.0 / jnp.sqrt(jnp.diag(cov_y) + eps)                   # dw_bn scale (gamma=1)
    b = -mean_y * a                                             # dw_bn shift (beta=0)

    w_eff = w_pw * a[None, :]                                   # (O, C)
    b_eff = w_pw @ b                                            # (O,)
    mean_z = w_eff @ mean_y + b_eff                             # pw_bn batch mean
    var_z = jnp.sum((w_eff @ cov_y) * w_eff, axis=1)            # exact propagation
    a2 = 1.0 / jnp.sqrt(var_z + eps)                            # pw_bn scale
    w2 = w_eff * a2[:, None]                                    # (O, C)
    b2 = (a2 * (b_eff - mean_z)).reshape(O, 1)                  # (O, 1)

    # ---- Kernel 2: folded (dw_bn -> 1x1 conv -> pw_bn) matmul + bias --------
    # Single un-gridded call: everything fits VMEM at these shapes, so we pay
    # one grid-step overhead instead of N, and w2 stays resident on the MXU.
    out = pl.pallas_call(
        _pw_conv_kernel,
        out_shape=jax.ShapeDtypeStruct((N, O, HW), jnp.float32),
        grid_spec=pltpu.PrefetchScalarGridSpec(
            num_scalar_prefetch=0, grid=(1,),
            in_specs=[pl.BlockSpec((N, C, HW), lambda i: (0, 0, 0)),
                      pl.BlockSpec((O, C), lambda i: (0, 0)),
                      pl.BlockSpec((O, 1), lambda i: (0, 0))],
            out_specs=pl.BlockSpec((N, O, HW), lambda i: (0, 0, 0))),
        compiler_params=pltpu.CompilerParams(
            dimension_semantics=("arbitrary",)),
    )(y, w2, b2)

    return out.reshape(N, O, H, W)   # free reshape back to NCHW


def _reference(x, w_dw, w_pw, eps=1e-5):
    """Pure-JAX reference of the same forward (NCHW), for a sanity check."""
    N, C, H, W = x.shape
    y = jax.lax.conv_general_dilated(
        x, w_dw, window_strides=(1, 1), padding=((1, 1), (1, 1)),
        dimension_numbers=("NCHW", "OIHW", "NCHW"), feature_group_count=C,
        precision=jax.lax.Precision.HIGHEST)
    mu = y.mean(axis=(0, 2, 3), keepdims=True)
    var = y.var(axis=(0, 2, 3), keepdims=True)          # biased, like PyTorch BN
    ybn = (y - mu) / jnp.sqrt(var + eps)
    z = jax.lax.conv_general_dilated(
        ybn, w_pw, window_strides=(1, 1), padding=((0, 0), (0, 0)),
        dimension_numbers=("NCHW", "OIHW", "NCHW"),
        precision=jax.lax.Precision.HIGHEST)
    mu2 = z.mean(axis=(0, 2, 3), keepdims=True)
    var2 = z.var(axis=(0, 2, 3), keepdims=True)
    return (z - mu2) / jnp.sqrt(var2 + eps)


if __name__ == "__main__":
    key = jax.random.PRNGKey(0)
    kx, kd, kp = jax.random.split(key, 3)

    # Depthwise-separable setup: groups == in_channels == out_channels.
    N, C, H, W = 2, 8, 16, 16
    x = jax.random.normal(kx, (N, C, H, W), dtype=jnp.float32)
    w_dw = 0.3 * jax.random.normal(kd, (C, 1, 3, 3), dtype=jnp.float32)
    w_pw = 0.3 * jax.random.normal(kp, (C, C, 1, 1), dtype=jnp.float32)

    out = separable_conv2d(x, w_dw, w_pw)
    out = jax.block_until_ready(out)

    ref = _reference(x, w_dw, w_pw)
    assert out.shape == (N, C, H, W)
    assert jnp.allclose(out, ref, atol=1e-3, rtol=1e-3), \
        float(jnp.max(jnp.abs(out - ref)))

    print("KERNEL_OK")
</pallas_src>

<mosaic_0001>
module attributes {stable_mosaic.version = 11 : i64} {
  func.func @_dw_conv_stats_kernel(%arg0: i32, %arg1: memref<1x8x256xf32, #tpu.memory_space<vmem>>, %arg2: memref<9x8x1xf32, #tpu.memory_space<vmem>>, %arg3: memref<9x1x256xf32, #tpu.memory_space<vmem>>, %arg4: memref<1x8x256xf32, #tpu.memory_space<vmem>>, %arg5: memref<1x8x1xf32, #tpu.memory_space<vmem>>, %arg6: memref<1x8x8xf32, #tpu.memory_space<vmem>>) attributes {dimension_semantics = [#tpu.dimension_semantics<parallel>], iteration_bounds = array<i64: 2>, scalar_prefetch = 0 : i64, scratch_operands = 0 : i64, tpu.core_type = #tpu.core_type<tc>, window_params = [{transform_indices = @transform_0, window_bounds = array<i64: 1, 8, 256>}, {pipeline_mode = #tpu.pipeline_mode<synchronous>, transform_indices = @transform_1, window_bounds = array<i64: 9, 8, 1>}, {pipeline_mode = #tpu.pipeline_mode<synchronous>, transform_indices = @transform_2, window_bounds = array<i64: 9, 1, 256>}, {transform_indices = @transform_3, window_bounds = array<i64: 1, 8, 256>}, {transform_indices = @transform_4, window_bounds = array<i64: 1, 8, 1>}, {transform_indices = @transform_5, window_bounds = array<i64: 1, 8, 8>}]} {
    %c0 = arith.constant 0 : index
    %c0_0 = arith.constant 0 : index
    %c0_1 = arith.constant 0 : index
    %0 = vector.load %arg1[%c0, %c0_0, %c0_1] : memref<1x8x256xf32, #tpu.memory_space<vmem>>, vector<1x8x256xf32>
    %1 = vector.shape_cast %0 : vector<1x8x256xf32> to vector<8x256xf32>
    %c4 = arith.constant 4 : index
    %c0_2 = arith.constant 0 : index
    %c0_3 = arith.constant 0 : index
    %2 = vector.load %arg2[%c4, %c0_2, %c0_3] : memref<9x8x1xf32, #tpu.memory_space<vmem>>, vector<1x8x1xf32>
    %3 = vector.shape_cast %2 : vector<1x8x1xf32> to vector<8x1xf32>
    %4 = vector.broadcast %3 : vector<8x1xf32> to vector<8x256xf32>
    %5 = arith.mulf %1, %4 : vector<8x256xf32>
    %c17_i32 = arith.constant 17 : i32
    %6 = tpu.dynamic_rotate %1 by %c17_i32 dim 1 : vector<8x256xf32>, i32 -> vector<8x256xf32>
    %c0_4 = arith.constant 0 : index
    %c0_5 = arith.constant 0 : index
    %c0_6 = arith.constant 0 : index
    %7 = vector.load %arg2[%c0_4, %c0_5, %c0_6] : memref<9x8x1xf32, #tpu.memory_space<vmem>>, vector<1x8x1xf32>
    %8 = vector.shape_cast %7 : vector<1x8x1xf32> to vector<8x1xf32>
    %9 = vector.broadcast %8 : vector<8x1xf32> to vector<8x256xf32>
    %10 = arith.mulf %6, %9 : vector<8x256xf32>
    %c0_7 = arith.constant 0 : index
    %c0_8 = arith.constant 0 : index
    %c0_9 = arith.constant 0 : index
    %11 = vector.load %arg3[%c0_7, %c0_8, %c0_9] : memref<9x1x256xf32, #tpu.memory_space<vmem>>, vector<1x1x256xf32>
    %12 = vector.shape_cast %11 : vector<1x1x256xf32> to vector<1x256xf32>
    %13 = vector.broadcast %12 : vector<1x256xf32> to vector<8x256xf32>
    %14 = arith.mulf %10, %13 : vector<8x256xf32>
    %15 = arith.addf %5, %14 : vector<8x256xf32>
    %c16_i32 = arith.constant 16 : i32
    %16 = tpu.dynamic_rotate %1 by %c16_i32 dim 1 : vector<8x256xf32>, i32 -> vector<8x256xf32>
    %c1 = arith.constant 1 : index
    %c0_10 = arith.constant 0 : index
    %c0_11 = arith.constant 0 : index
    %17 = vector.load %arg2[%c1, %c0_10, %c0_11] : memref<9x8x1xf32, #tpu.memory_space<vmem>>, vector<1x8x1xf32>
    %18 = vector.shape_cast %17 : vector<1x8x1xf32> to vector<8x1xf32>
    %19 = vector.broadcast %18 : vector<8x1xf32> to vector<8x256xf32>
    %20 = arith.mulf %16, %19 : vector<8x256xf32>
    %c1_12 = arith.constant 1 : index
    %c0_13 = arith.constant 0 : index
    %c0_14 = arith.constant 0 : index
    %21 = vector.load %arg3[%c1_12, %c0_13, %c0_14] : memref<9x1x256xf32, #tpu.memory_space<vmem>>, vector<1x1x256xf32>
    %22 = vector.shape_cast %21 : vector<1x1x256xf32> to vector<1x256xf32>
    %23 = vector.broadcast %22 : vector<1x256xf32> to vector<8x256xf32>
    %24 = arith.mulf %20, %23 : vector<8x256xf32>
    %25 = arith.addf %15, %24 : vector<8x256xf32>
    %c15_i32 = arith.constant 15 : i32
    %26 = tpu.dynamic_rotate %1 by %c15_i32 dim 1 : vector<8x256xf32>, i32 -> vector<8x256xf32>
    %c2 = arith.constant 2 : index
    %c0_15 = arith.constant 0 : index
    %c0_16 = arith.constant 0 : index
    %27 = vector.load %arg2[%c2, %c0_15, %c0_16] : memref<9x8x1xf32, #tpu.memory_space<vmem>>, vector<1x8x1xf32>
    %28 = vector.shape_cast %27 : vector<1x8x1xf32> to vector<8x1xf32>
    %29 = vector.broadcast %28 : vector<8x1xf32> to vector<8x256xf32>
    %30 = arith.mulf %26, %29 : vector<8x256xf32>
    %c2_17 = arith.constant 2 : index
    %c0_18 = arith.constant 0 : index
    %c0_19 = arith.constant 0 : index
    %31 = vector.load %arg3[%c2_17, %c0_18, %c0_19] : memref<9x1x256xf32, #tpu.memory_space<vmem>>, vector<1x1x256xf32>
    %32 = vector.shape_cast %31 : vector<1x1x256xf32> to vector<1x256xf32>
    %33 = vector.broadcast %32 : vector<1x256xf32> to vector<8x256xf32>
    %34 = arith.mulf %30, %33 : vector<8x256xf32>
    %35 = arith.addf %25, %34 : vector<8x256xf32>
    %c1_i32 = arith.constant 1 : i32
    %36 = tpu.dynamic_rotate %1 by %c1_i32 dim 1 : vector<8x256xf32>, i32 -> vector<8x256xf32>
    %c3 = arith.constant 3 : index
    %c0_20 = arith.constant 0 : index
    %c0_21 = arith.constant 0 : index
    %37 = vector.load %arg2[%c3, %c0_20, %c0_21] : memref<9x8x1xf32, #tpu.memory_space<vmem>>, vector<1x8x1xf32>
    %38 = vector.shape_cast %37 : vector<1x8x1xf32> to vector<8x1xf32>
    %39 = vector.broadcast %38 : vector<8x1xf32> to vector<8x256xf32>
    %40 = arith.mulf %36, %39 : vector<8x256xf32>
    %c3_22 = arith.constant 3 : index
    %c0_23 = arith.constant 0 : index
    %c0_24 = arith.constant 0 : index
    %41 = vector.load %arg3[%c3_22, %c0_23, %c0_24] : memref<9x1x256xf32, #tpu.memory_space<vmem>>, vector<1x1x256xf32>
    %42 = vector.shape_cast %41 : vector<1x1x256xf32> to vector<1x256xf32>
    %43 = vector.broadcast %42 : vector<1x256xf32> to vector<8x256xf32>
    %44 = arith.mulf %40, %43 : vector<8x256xf32>
    %45 = arith.addf %35, %44 : vector<8x256xf32>
    %c255_i32 = arith.constant 255 : i32
    %46 = tpu.dynamic_rotate %1 by %c255_i32 dim 1 : vector<8x256xf32>, i32 -> vector<8x256xf32>
    %c5 = arith.constant 5 : index
    %c0_25 = arith.constant 0 : index
    %c0_26 = arith.constant 0 : index
    %47 = vector.load %arg2[%c5, %c0_25, %c0_26] : memref<9x8x1xf32, #tpu.memory_space<vmem>>, vector<1x8x1xf32>
    %48 = vector.shape_cast %47 : vector<1x8x1xf32> to vector<8x1xf32>
    %49 = vector.broadcast %48 : vector<8x1xf32> to vector<8x256xf32>
    %50 = arith.mulf %46, %49 : vector<8x256xf32>
    %c5_27 = arith.constant 5 : index
    %c0_28 = arith.constant 0 : index
    %c0_29 = arith.constant 0 : index
    %51 = vector.load %arg3[%c5_27, %c0_28, %c0_29] : memref<9x1x256xf32, #tpu.memory_space<vmem>>, vector<1x1x256xf32>
    %52 = vector.shape_cast %51 : vector<1x1x256xf32> to vector<1x256xf32>
    %53 = vector.broadcast %52 : vector<1x256xf32> to vector<8x256xf32>
    %54 = arith.mulf %50, %53 : vector<8x256xf32>
    %55 = arith.addf %45, %54 : vector<8x256xf32>
    %c241_i32 = arith.constant 241 : i32
    %56 = tpu.dynamic_rotate %1 by %c241_i32 dim 1 : vector<8x256xf32>, i32 -> vector<8x256xf32>
    %c6 = arith.constant 6 : index
    %c0_30 = arith.constant 0 : index
    %c0_31 = arith.constant 0 : index
    %57 = vector.load %arg2[%c6, %c0_30, %c0_31] : memref<9x8x1xf32, #tpu.memory_space<vmem>>, vector<1x8x1xf32>
    %58 = vector.shape_cast %57 : vector<1x8x1xf32> to vector<8x1xf32>
    %59 = vector.broadcast %58 : vector<8x1xf32> to vector<8x256xf32>
    %60 = arith.mulf %56, %59 : vector<8x256xf32>
    %c6_32 = arith.constant 6 : index
    %c0_33 = arith.constant 0 : index
    %c0_34 = arith.constant 0 : index
    %61 = vector.load %arg3[%c6_32, %c0_33, %c0_34] : memref<9x1x256xf32, #tpu.memory_space<vmem>>, vector<1x1x256xf32>
    %62 = vector.shape_cast %61 : vector<1x1x256xf32> to vector<1x256xf32>
    %63 = vector.broadcast %62 : vector<1x256xf32> to vector<8x256xf32>
    %64 = arith.mulf %60, %63 : vector<8x256xf32>
    %65 = arith.addf %55, %64 : vector<8x256xf32>
    %c240_i32 = arith.constant 240 : i32
    %66 = tpu.dynamic_rotate %1 by %c240_i32 dim 1 : vector<8x256xf32>, i32 -> vector<8x256xf32>
    %c7 = arith.constant 7 : index
    %c0_35 = arith.constant 0 : index
    %c0_36 = arith.constant 0 : index
    %67 = vector.load %arg2[%c7, %c0_35, %c0_36] : memref<9x8x1xf32, #tpu.memory_space<vmem>>, vector<1x8x1xf32>
    %68 = vector.shape_cast %67 : vector<1x8x1xf32> to vector<8x1xf32>
    %69 = vector.broadcast %68 : vector<8x1xf32> to vector<8x256xf32>
    %70 = arith.mulf %66, %69 : vector<8x256xf32>
    %c7_37 = arith.constant 7 : index
    %c0_38 = arith.constant 0 : index
    %c0_39 = arith.constant 0 : index
    %71 = vector.load %arg3[%c7_37, %c0_38, %c0_39] : memref<9x1x256xf32, #tpu.memory_space<vmem>>, vector<1x1x256xf32>
    %72 = vector.shape_cast %71 : vector<1x1x256xf32> to vector<1x256xf32>
    %73 = vector.broadcast %72 : vector<1x256xf32> to vector<8x256xf32>
    %74 = arith.mulf %70, %73 : vector<8x256xf32>
    %75 = arith.addf %65, %74 : vector<8x256xf32>
    %c239_i32 = arith.constant 239 : i32
    %76 = tpu.dynamic_rotate %1 by %c239_i32 dim 1 : vector<8x256xf32>, i32 -> vector<8x256xf32>
    %c8 = arith.constant 8 : index
    %c0_40 = arith.constant 0 : index
    %c0_41 = arith.constant 0 : index
    %77 = vector.load %arg2[%c8, %c0_40, %c0_41] : memref<9x8x1xf32, #tpu.memory_space<vmem>>, vector<1x8x1xf32>
    %78 = vector.shape_cast %77 : vector<1x8x1xf32> to vector<8x1xf32>
    %79 = vector.broadcast %78 : vector<8x1xf32> to vector<8x256xf32>
    %80 = arith.mulf %76, %79 : vector<8x256xf32>
    %c8_42 = arith.constant 8 : index
    %c0_43 = arith.constant 0 : index
    %c0_44 = arith.constant 0 : index
    %81 = vector.load %arg3[%c8_42, %c0_43, %c0_44] : memref<9x1x256xf32, #tpu.memory_space<vmem>>, vector<1x1x256xf32>
    %82 = vector.shape_cast %81 : vector<1x1x256xf32> to vector<1x256xf32>
    %83 = vector.broadcast %82 : vector<1x256xf32> to vector<8x256xf32>
    %84 = arith.mulf %80, %83 : vector<8x256xf32>
    %85 = arith.addf %75, %84 : vector<8x256xf32>
    %c0_45 = arith.constant 0 : index
    %c0_46 = arith.constant 0 : index
    %c0_47 = arith.constant 0 : index
    %86 = vector.load %arg4[%c0_45, %c0_46, %c0_47] : memref<1x8x256xf32, #tpu.memory_space<vmem>>, vector<1x8x256xf32>
    %87 = vector.shape_cast %86 : vector<1x8x256xf32> to vector<8x256xf32>
    %88 = vector.shape_cast %85 : vector<8x256xf32> to vector<1x8x256xf32>
    tpu.vector_store %arg4[%c0_45, %c0_46, %c0_47], %88 {strides = array<i32>} : memref<1x8x256xf32, #tpu.memory_space<vmem>>, vector<1x8x256xf32>,
    %cst = arith.constant dense<0.000000e+00> : vector<8xf32>
    %89 = vector.multi_reduction <add>, %85, %cst [1] : vector<8x256xf32> to vector<8xf32>
    %90 = vector.shape_cast %89 : vector<8xf32> to vector<8x1xf32>
    %c0_48 = arith.constant 0 : index
    %c0_49 = arith.constant 0 : index
    %c0_50 = arith.constant 0 : index
    %91 = vector.load %arg5[%c0_48, %c0_49, %c0_50] : memref<1x8x1xf32, #tpu.memory_space<vmem>>, vector<1x8x1xf32>
    %92 = vector.shape_cast %91 : vector<1x8x1xf32> to vector<8x1xf32>
    %93 = vector.shape_cast %90 : vector<8x1xf32> to vector<1x8x1xf32>
    tpu.vector_store %arg5[%c0_48, %c0_49, %c0_50], %93 {strides = array<i32>} : memref<1x8x1xf32, #tpu.memory_space<vmem>>, vector<1x8x1xf32>,
    %cst_51 = arith.constant dense<0.000000e+00> : vector<8x8xf32>
    %94 = tpu.matmul %85, %85, %cst_51 {dimension_numbers = #tpu.dot_dimension_numbers<[1], [1], [0], [0], [0, 0, 1, 0], [], []>, precision = #tpu.contract_precision<fp32>} : vector<8x256xf32>, vector<8x256xf32>, vector<8x8xf32> -> vector<8x8xf32>
    %c0_52 = arith.constant 0 : index
    %c0_53 = arith.constant 0 : index
    %c0_54 = arith.constant 0 : index
    %95 = vector.load %arg6[%c0_52, %c0_53, %c0_54] : memref<1x8x8xf32, #tpu.memory_space<vmem>>, vector<1x8x8xf32>
    %96 = vector.shape_cast %95 : vector<1x8x8xf32> to vector<8x8xf32>
    %97 = vector.shape_cast %94 : vector<8x8xf32> to vector<1x8x8xf32>
    tpu.vector_store %arg6[%c0_52, %c0_53, %c0_54], %97 {strides = array<i32>} : memref<1x8x8xf32, #tpu.memory_space<vmem>>, vector<1x8x8xf32>,
    return
  }
  func.func @transform_0(%arg0: i32) -> (i32, i32, i32) {
    %c0_i32 = arith.constant 0 : i32
    %c0_i32_0 = arith.constant 0 : i32
    %c0_i32_1 = arith.constant 0 : i32
    return %arg0, %c0_i32, %c0_i32_0 : i32, i32, i32
  }
  func.func @transform_1(%arg0: i32) -> (i32, i32, i32) {
    %c0_i32 = arith.constant 0 : i32
    %c0_i32_0 = arith.constant 0 : i32
    %c0_i32_1 = arith.constant 0 : i32
    %c0_i32_2 = arith.constant 0 : i32
    return %c0_i32, %c0_i32_0, %c0_i32_1 : i32, i32, i32
  }
  func.func @transform_2(%arg0: i32) -> (i32, i32, i32) {
    %c0_i32 = arith.constant 0 : i32
    %c0_i32_0 = arith.constant 0 : i32
    %c0_i32_1 = arith.constant 0 : i32
    %c0_i32_2 = arith.constant 0 : i32
    return %c0_i32, %c0_i32_0, %c0_i32_1 : i32, i32, i32
  }
  func.func @transform_3(%arg0: i32) -> (i32, i32, i32) {
    %c0_i32 = arith.constant 0 : i32
    %c0_i32_0 = arith.constant 0 : i32
    %c0_i32_1 = arith.constant 0 : i32
    return %arg0, %c0_i32, %c0_i32_0 : i32, i32, i32
  }
  func.func @transform_4(%arg0: i32) -> (i32, i32, i32) {
    %c0_i32 = arith.constant 0 : i32
    %c0_i32_0 = arith.constant 0 : i32
    %c0_i32_1 = arith.constant 0 : i32
    return %arg0, %c0_i32, %c0_i32_0 : i32, i32, i32
  }
  func.func @transform_5(%arg0: i32) -> (i32, i32, i32) {
    %c0_i32 = arith.constant 0 : i32
    %c0_i32_0 = arith.constant 0 : i32
    %c0_i32_1 = arith.constant 0 : i32
    return %arg0, %c0_i32, %c0_i32_0 : i32, i32, i32
  }
}

</mosaic_0001>

<bundles_post_ra>
// kernel: tpu_custom_call.1
= control target key start
LH: loop header
LB: loop body
LE: loop exit
PB: predicated region body
PF: predicated region fallthrough
CT: control target
= control target key end

     0   :  { %11 = vsyncpa [#allocation3], 0  ;;  %s1626_s0 = inlined_call_operand.vmem [shape: f32[2,8,256], index: 0, kind: input, shape index: {}]   ;;  %s1627_s1 = inlined_call_operand.vmem [shape: f32[9,8,1], index: 1, kind: input, shape index: {}]   ;;  %s1628_s2 = inlined_call_operand.vmem [shape: f32[9,1,256], index: 2, kind: input, shape index: {}]   ;;  %s1629_s3 = inlined_call_operand.hbm [shape: f32[2,8,256], index: 3, kind: output, shape index: {0}]   ;;  %s1630_s4 = inlined_call_operand.vmem [shape: f32[2,8,1], index: 4, kind: output, shape index: {1}]   ;;  %s1631_s5 = inlined_call_operand.hbm [shape: f32[2,8,8], index: 5, kind: output, shape index: {2}]  }
   0x1   :  { %13 = vsyncpa [#allocation3 + $0x1], 0 }
   0x2   :  { %14 = vsyncpa [#allocation5], 0 }
   0x3   :  { %16 = vsyncpa [#allocation5 + $0x1], 0  ;;  %s1376_s18 = smov 0   ;;  %s1378_s19 = smov 0  }
   0x4   :  { %s1380_s20 = smov 0   ;;  %s1382_s21 = smov 0  }
   0x5 LB: > { %s1397_s22 = sadd.s32 4294967295, %s1333_s21   ;;  %s1155_s23 = sadd.s32 4294967294, %s1333_s21   ;;  %s1333_s21 = sphi %s1382_s21, %s1637_s21   ;;  %s1329_s20 = sphi %s1380_s20, %s1636_s20   ;;  %s1325_s19 = sphi %s1378_s19, %s1635_s19   ;;  %s1321_s18 = sphi %s1376_s18, %s1634_s18  }
   0x6   : > { %s1401_s24 = sadd.s32 1, %s1333_s21   ;;  %s97_s25 = sadd.s32 1, %s1329_s20 }
   0x7   : > { %s94_s26 = ssub.s32 %s1333_s21, %s1401_s24  ;;  %p107_p0 = scmp.ne.s32.totalorder %s1329_s20, %s1325_s19 }
   0x8   : > { %p95_p1 = scmp.eq.s32.totalorder %s94_s26, 0  ;;  %p108_p2 = scmp.eq.s32.totalorder %s1397_s22, 1 }
   0x9   : > { %p113_p3 = scmp.ne.s32.totalorder %s1325_s19, %s1321_s18  ;;  %p114_p4 = scmp.eq.s32.totalorder %s1155_s23, 1 }
   0xa   : > { %s1412_s27 = scalar_select %p95_p1, %s1329_s20, %s97_s25  }
   0xb   : > { %p1414_p5 = por %p108_p2, %p107_p0  ;;  %p1418_p6 = por %p114_p4, %p113_p3 }
   0xc   : > { %p1158_p7 = scmp.ge.s32.totalorder %s1333_s21, 1  ;;  %p198_p8 = scmp.lt.s32.totalorder %s1333_s21, 3 }
   0xe   : > { %p199_p9 = pnand %p1158_p7, %p198_p8 }
   0xf   : > { %p235_p10 = scmp.lt.s32.totalorder (!%p199_p9), %s1397_s22, 1  ;;  %s1336_s16 = smov (!%p199_p9), 17  }
  0x10   : > { %202 = sbr.rel (%p199_p9) target bundleno = 432 (0x1b0), region = 32  ;;  %s1337_s25 = smov (!%p199_p9), 16  }
  0x11   : > { %s1338_s6 = smov (!%p199_p9), 15   ;;  %s1339_s10 = smov (!%p199_p9), 1  }
  0x12   : > { %s1340_s13 = smov (!%p199_p9), 127   ;;  %s1343_s26 = smov (!%p199_p9), 111  }
  0x13   : > { %s1344_s17 = smov (!%p199_p9), [#allocation2]  }
  0x14   : > { %s1247_s23 = sshll.u32 (!%p199_p9), %s1344_s17, 4  ;;  %s1248_s23 = int_to_ptr.vmem [resolvable:$false] %s1247_s23 }
  0x15   : > { %v1165_v0 = vld [vmem:[%s1627_s1 + $0x8] sm:$0xff]  ;;  %v264_v1 = vld [vmem:[%s1627_s1] sm:$0xff]  ;;  %v1335_v2 = vmov 0   ;;  %s1432_s9 = scalar_select %p235_p10, %s1397_s22, 1  ;;  %v1167_v6 = vld [vmem:[%s1627_s1 + $0x10] sm:$0xff]  ;;  %v259_v20 = vlaneseq }
  0x16   : > { %1242 = vset.pattern.permute.xlu1 %v1335_v2  ;;  %1241 = vset.pattern.permute.xlu0 %v1335_v2  ;;  %v1164_v3 = vld [vmem:[%s1627_s1 + $0x20] sm:$0xff]  ;;  %v1169_v7 = vld [vmem:[%s1627_s1 + $0x18] sm:$0xff]  ;;  %v1171_v8 = vld [vmem:[%s1627_s1 + $0x28] sm:$0xff] }
  0x17   : > { %299 = vperm.xlu1 %1242, %v1165_v0   ;;  %267 = vperm.xlu0 %1241, %v264_v1   ;;  %s1186_s12 = sshll.u32 %s1432_s9, 4  ;;  %v1173_v9 = vld [vmem:[%s1627_s1 + $0x30] sm:$0xff]  ;;  %v1175_v10 = vld [vmem:[%s1627_s1 + $0x38] sm:$0xff]  ;;  %v1177_v11 = vld [vmem:[%s1627_s1 + $0x40] sm:$0xff]  ;;  %v1479_v23 = vand.u32 127, %v259_v20  ;;  %v275_v26 = vshrl.u32 %v259_v20, 7 }
  0x18   : > { %s239_s15 = scalar_lea.vmem %s1626_s0, %s1186_s12  ;;  %v272_v31 = vld [vmem:[%s1628_s2] sm:$0x3]  ;;  %v1166_v34 = vld [vmem:[%s1628_s2 + $0x2] sm:$0x3]  ;;  %v1168_v43 = vld [vmem:[%s1628_s2 + $0x4] sm:$0x3] }
  0x19   : > { %v1441_v4 = vld [vmem:[%s239_s15] sm:$0xff]  ;;  %v1444_v5 = vld [vmem:[%s239_s15 + $0x8] sm:$0xff]  ;;  %vm261_vm0 = vcmp.lt.s32.totalorder %v1479_v23, 17  ;;  %v1484_v29 = vsub.s32 0, %v275_v26  ;;  %v1486_v30 = vsub.s32 1, %v275_v26  ;;  %vm292_vm1 = vcmp.lt.s32.totalorder %v1479_v23, 16 }
  0x1a   : > { %vm325_vm2 = vcmp.lt.s32.totalorder %v1479_v23, 15  ;;  %v1170_v44 = vld [vmem:[%s1628_s2 + $0x6] sm:$0x3]  ;;  %vm358_vm3 = vcmp.lt.s32.totalorder %v1479_v23, 1  ;;  %vm391_vm4 = vcmp.lt.s32.totalorder %v1479_v23, 127  ;;  %vm424_vm5 = vcmp.lt.s32.totalorder %v1479_v23, 113 }
  0x1b   : > { %250 = vperm.xlu0 %1241, %v1164_v3   ;;  %255 = vrot.lane.b32.xlu1 %v1441_v4, %s1336_s16  ;;  %v277_v39 = vrot.slane %v272_v31, %v1484_v29  ;;  %v281_v40 = vrot.slane %v272_v31, %v1486_v30  ;;  %v310_v45 = vrot.slane %v1166_v34, %v1484_v29  ;;  %v1172_v63 = vld [vmem:[%s1628_s2 + $0xa] sm:$0x3]  ;;  %vm457_vm6 = vcmp.lt.s32.totalorder %v1479_v23, 112 }
  0x1c   : > { %v314_v46 = vrot.slane %v1166_v34, %v1486_v30  ;;  %v343_v52 = vrot.slane %v1168_v43, %v1484_v29  ;;  %v347_v53 = vrot.slane %v1168_v43, %v1486_v30  ;;  %v376_v54 = vrot.slane %v1170_v44, %v1484_v29  ;;  %v1178_v43 = vld [vmem:[%s1628_s2 + $0x10] sm:$0x3] }
  0x1d   : > { %v380_v62 = vrot.slane %v1170_v44, %v1486_v30  ;;  %vm490_vm7 = vcmp.lt.s32.totalorder %v1479_v23, 111 }
  0x1f   : > { %257 = vrot.lane.b32.xlu0 %v1444_v5, %s1336_s16  ;;  %332 = vperm.xlu1 %1242, %v1167_v6   ;;  %s1341_s16 = smov 113  }
  0x23   : > { %288 = vrot.lane.b32.xlu0 %v1441_v4, %s1337_s25  ;;  %290 = vrot.lane.b32.xlu1 %v1444_v5, %s1337_s25  ;;  %s1342_s25 = smov 112  }
  0x27   : > { %365 = vperm.xlu0 %1241, %v1169_v7   ;;  %321 = vrot.lane.b32.xlu1 %v1441_v4, %s1338_s6 }
  0x2b   : > { %323 = vrot.lane.b32.xlu0 %v1444_v5, %s1338_s6  ;;  %398 = vperm.xlu1 %1242, %v1171_v8   ;;  %s1552_s6 = sand.u32 1, %s1325_s19  }
  0x2c   : > { %s1159_s7 = sshll.u32 %s1552_s6, 4  ;;  %s1001_s15 = scalar_lea.sflag [#allocation3], %s1552_s6 }
  0x2d   : > { %s1559_s8 = scalar_lea.vmem [#allocation2], %s1159_s7 }
  0x2e   : > { %s1024_s14 = sshll.u32 %s1559_s8, 4  ;;  %s1025_s14 = int_to_ptr.vmem [resolvable:$true] %s1024_s14 }
  0x2f   : > { %354 = vrot.lane.b32.xlu0 %v1441_v4, %s1339_s10  ;;  %356 = vrot.lane.b32.xlu1 %v1444_v5, %s1339_s10  ;;  %s1187_s10 = sshll.u32 %s1397_s22, 8  ;;  %p1250_p0 = scmp.lt.s32.totalorder %s1025_s14, %s1248_s23 }
  0x33   : > { %431 = vperm.xlu0 %1241, %v1173_v9   ;;  %387 = vrot.lane.b32.xlu1 %v1441_v4, %s1340_s13 }
  0x37   : > { %389 = vrot.lane.b32.xlu0 %v1444_v5, %s1340_s13  ;;  %464 = vperm.xlu1 %1242, %v1175_v10   ;;  %s1022_s13 = scalar_lea.hbm %s1629_s3, %s1187_s10 }
  0x3b   : > { %420 = vrot.lane.b32.xlu0 %v1441_v4, %s1341_s16  ;;  %422 = vrot.lane.b32.xlu1 %v1444_v5, %s1341_s16  ;;  %s1243_s16 = scalar_lea.vmem %s1025_s14, 256 }
  0x3c   : > { %p1244_p11 = scmp.ne.s32.totalorder %s1025_s14, %s1243_s16 }
  0x3e   : > { %p1245_p12 = pnand %p1244_p11, %p1414_p5 }
  0x3f   : > { %497 = vperm.xlu0 %1241, %v1177_v11   ;;  %453 = vrot.lane.b32.xlu1 %v1441_v4, %s1342_s25  ;;  %v1174_v11 = vld [vmem:[%s1628_s2 + $0xc] sm:$0x3] }
  0x40   : > { %p1246_p13 = pneg %p1245_p12 }
  0x43   : > { %455 = vrot.lane.b32.xlu0 %v1444_v5, %s1342_s25  ;;  %486 = vrot.lane.b32.xlu1 %v1441_v4, %s1343_s26  ;;  %s1249_s25 = scalar_lea.vmem %s1248_s23, 512 }
  0x44   : > { %p1251_p1 = scmp.lt.s32.totalorder %s1249_s25, %s1243_s16 }
  0x46   : > { %p1252_p2 = por %p1251_p1, %p1250_p0 }
  0x47   : > { %488 = vrot.lane.b32.xlu0 %v1444_v5, %s1343_s26 }
  0x48   : > { %p1253_p3 = pnand %p1252_p2, %p1246_p13 }
  0x92   : > { %v300_v12 = vpop.permute.xlu1 %299  ;;  %v268_v13 = vpop.permute.xlu0 %267 }
  0x96   : > { %v251_v14 = vpop.permute.xlu0 %250  ;;  %v256_v15 = vpop.permute.xlu1 %255 }
  0x97   : > { %v253_v0 = vmul.f32 %v251_v14, %v1441_v4  ;;  %v254_v1 = vmul.f32 %v251_v14, %v1444_v5  ;;  %v409_v5 = vrot.slane %v1172_v63, %v1484_v29 }
  0x9a   : > { %v258_v16 = vpop.permute.xlu0 %257  ;;  %v333_v17 = vpop.permute.xlu1 %332 }
  0x9b   : > { %v262_v32 = vsel %vm261_vm0, %v256_v15, %v258_v16  ;;  %v263_v33 = vsel %vm261_vm0, %v258_v16, %v256_v15 }
  0x9c   : > { %v270_v41 = vmul.f32 %v268_v13, %v263_v33  ;;  %v271_v42 = vmul.f32 %v268_v13, %v262_v32  ;;  %v446_v33 = vrot.slane %v1174_v11, %v1486_v30 }
  0x9e   : > { %v289_v18 = vpop.permute.xlu0 %288  ;;  %v291_v19 = vpop.permute.xlu1 %290  ;;  %v284_v56 = vmul.f32 %v277_v39, %v270_v41  ;;  %v285_v57 = vmul.f32 %v281_v40, %v271_v42 }
  0x9f   : > { %v293_v36 = vsel %vm292_vm1, %v289_v18, %v291_v19  ;;  %v294_v37 = vsel %vm292_vm1, %v291_v19, %v289_v18  ;;  %v413_v18 = vrot.slane %v1172_v63, %v1486_v30 }
  0xa0   : > { %v302_v47 = vmul.f32 %v300_v12, %v294_v37  ;;  %v303_v48 = vmul.f32 %v300_v12, %v293_v36  ;;  %v286_v13 = vadd.f32 %v284_v56, %v253_v0  ;;  %v287_v4 = vadd.f32 %v285_v57, %v254_v1 }
  0xa2   : > { %v366_v21 = vpop.permute.xlu0 %365  ;;  %v322_v22 = vpop.permute.xlu1 %321  ;;  %v317_v2 = vmul.f32 %v310_v45, %v302_v47  ;;  %v318_v3 = vmul.f32 %v314_v46, %v303_v48 }
  0xa4   : > { %v319_v26 = vadd.f32 %v317_v2, %v286_v13 }
  0xa6   : > { %v324_v24 = vpop.permute.xlu0 %323  ;;  %v1481_v25 = vpop.permute.xlu1 %398 }
  0xa7   : > { %v326_v49 = vsel %vm325_vm2, %v322_v22, %v324_v24  ;;  %v327_v50 = vsel %vm325_vm2, %v324_v24, %v322_v22  ;;  %v1176_v24 = vld [vmem:[%s1628_s2 + $0xe] sm:$0x3] }
  0xa8   : > { %v335_v60 = vmul.f32 %v333_v17, %v327_v50  ;;  %v336_v61 = vmul.f32 %v333_v17, %v326_v49  ;;  %v479_v42 = vrot.slane %v1176_v24, %v1486_v30 }
  0xaa   : > { %v355_v27 = vpop.permute.xlu0 %354  ;;  %v357_v28 = vpop.permute.xlu1 %356  ;;  %v350_v14 = vmul.f32 %v343_v52, %v335_v60  ;;  %v351_v15 = vmul.f32 %v347_v53, %v336_v61  ;;  %v508_v52 = vrot.slane %v1178_v43, %v1484_v29  ;;  %v512_v53 = vrot.slane %v1178_v43, %v1486_v30 }
  0xab   : > { %v359_v58 = vsel %vm358_vm3, %v355_v27, %v357_v28  ;;  %v360_v59 = vsel %vm358_vm3, %v357_v28, %v355_v27  ;;  %v320_v27 = vadd.f32 %v318_v3, %v287_v4 }
  0xac   : > { %v368_v7 = vmul.f32 %v366_v21, %v360_v59  ;;  %v369_v8 = vmul.f32 %v366_v21, %v359_v58  ;;  %v442_v21 = vrot.slane %v1174_v11, %v1484_v29 }
  0xad   : > { %v353_v37 = vadd.f32 %v351_v15, %v320_v27 }
  0xae   : > { %v1495_v35 = vpop.permute.xlu0 %431  ;;  %v388_v38 = vpop.permute.xlu1 %387  ;;  %v383_v28 = vmul.f32 %v376_v54, %v368_v7  ;;  %v384_v31 = vmul.f32 %v380_v62, %v369_v8 }
  0xb2   : > { %v390_v51 = vpop.permute.xlu0 %389  ;;  %v465_v55 = vpop.permute.xlu1 %464 }
  0xb3   : > { %v392_v9 = vsel %vm391_vm4, %v388_v38, %v390_v51  ;;  %v393_v10 = vsel %vm391_vm4, %v390_v51, %v388_v38  ;;  %v475_v38 = vrot.slane %v1176_v24, %v1484_v29 }
  0xb4   : > { %v401_v19 = vmul.f32 %v1481_v25, %v392_v9  ;;  %v402_v20 = vmul.f32 %v1481_v25, %v393_v10  ;;  %v352_v25 = vadd.f32 %v350_v14, %v319_v26 }
  0xb6   : > { %v421_v6 = vpop.permute.xlu0 %420  ;;  %v423_v12 = vpop.permute.xlu1 %422  ;;  %v416_v39 = vmul.f32 %v409_v5, %v401_v19  ;;  %v417_v40 = vmul.f32 %v413_v18, %v402_v20  ;;  %v385_v44 = vadd.f32 %v383_v28, %v352_v25 }
  0xb7   : > { %v425_v16 = vsel %vm424_vm5, %v421_v6, %v423_v12  ;;  %v426_v17 = vsel %vm424_vm5, %v423_v12, %v421_v6 }
  0xb8   : > { %v434_v34 = vmul.f32 %v1495_v35, %v425_v16  ;;  %v435_v36 = vmul.f32 %v1495_v35, %v426_v17  ;;  %v386_v35 = vadd.f32 %v384_v31, %v353_v37  ;;  %v418_v54 = vadd.f32 %v416_v39, %v385_v44 }
  0xba   : > { %v498_v22 = vpop.permute.xlu0 %497  ;;  %v454_v32 = vpop.permute.xlu1 %453  ;;  %v449_v47 = vmul.f32 %v442_v21, %v434_v34  ;;  %v450_v48 = vmul.f32 %v446_v33, %v435_v36  ;;  %v419_v56 = vadd.f32 %v417_v40, %v386_v35 }
  0xbc   : > { %v452_v62 = vadd.f32 %v450_v48, %v419_v56 }
  0xbe   : > { %v456_v41 = vpop.permute.xlu0 %455  ;;  %v487_v51 = vpop.permute.xlu1 %486 }
  0xbf   : > { %v458_v45 = vsel %vm457_vm6, %v454_v32, %v456_v41  ;;  %v459_v46 = vsel %vm457_vm6, %v456_v41, %v454_v32 }
  0xc0   : > { %v467_v49 = vmul.f32 %v465_v55, %v458_v45  ;;  %v468_v50 = vmul.f32 %v465_v55, %v459_v46  ;;  %v451_v55 = vadd.f32 %v449_v47, %v418_v54 }
  0xc2   : > { %v482_v57 = vmul.f32 %v475_v38, %v467_v49  ;;  %v483_v58 = vmul.f32 %v479_v42, %v468_v50  ;;  %v489_v59 = vpop.permute.xlu0 %488 }
  0xc3   : > { %v491_v60 = vsel %vm490_vm7, %v487_v51, %v489_v59  ;;  %v492_v61 = vsel %vm490_vm7, %v489_v59, %v487_v51 }
  0xc4   : > { %v500_v63 = vmul.f32 %v498_v22, %v491_v60  ;;  %v501_v29 = vmul.f32 %v498_v22, %v492_v61  ;;  %v484_v30 = vadd.f32 %v482_v57, %v451_v55  ;;  %v485_v0 = vadd.f32 %v483_v58, %v452_v62 }
  0xc6   : > { %v515_v1 = vmul.f32 %v508_v52, %v500_v63  ;;  %v516_v2 = vmul.f32 %v512_v53, %v501_v29 }
  0xc8   : > { %v517_v3 = vadd.f32 %v515_v1, %v484_v30  ;;  %v518_v6 = vadd.f32 %v516_v2, %v485_v0 }
  0xca   : > { %v556_v7 = vand.u32 4294901760, %v518_v6  ;;  %v558_v8 = vand.u32 4294901760, %v517_v3  ;;  %v521_v9 = vadd.f32 %v518_v6, %v517_v3  ;;  %519 = vst [vmem:[%s1559_s8] sm:$0xff] %v517_v3  ;;  %520 = vst [vmem:[%s1559_s8 + $0x8] sm:$0xff] %v518_v6 }
  0xcc   : > { %557 = vmatprep.subr.mxu0 %v556_v7  ;;  %683 = vmatprep.mubr.f32.mxu1 %v556_v7  ;;  %v593_v23 = vsub.f32 %v518_v6, %v556_v7  ;;  %v599_v10 = vsub.f32 %v517_v3, %v558_v8 }
  0xcd   : > { %522 = vadd.xlane.f32.xlu1 %v521_v9  ;;  %559 = vmatpush1.xpose.msra.mxu0 %v558_v8 }
  0xce   : > { %722 = vmatprep.subr.mxu0 %v593_v23  ;;  %v594_v11 = vand.u32 4294901760, %v593_v23  ;;  %v600_v12 = vand.u32 4294901760, %v599_v10 }
  0xd0   : > { %v595_v13 = vsub.f32 %v593_v23, %v594_v11  ;;  %v601_v4 = vsub.f32 %v599_v10, %v600_v12 }
  0xd2   : > { %v596_v5 = vand.u32 4294901760, %v595_v13  ;;  %v602_v14 = vand.u32 4294901760, %v601_v4 }
  0xd4   : > { %597 = vmatprep.mubr.f32.mxu0 %v596_v5  ;;  %643 = vmatprep.subr.mxu1 %v596_v5 }
  0xd5   : > { %603 = vmatmul.mubr.f32.vlgmr.msra.gmra.mxu0 %v602_v14  ;;  %649 = vmatpush1.xpose.msra.mxu1 %v602_v14 }
  0xd6   : > { %725 = vmatpush1.xpose.msra.mxu0 %v599_v10  ;;  %760 = vmatprep.mubr.f32.mxu0 %v593_v23 }
  0xd7   : > { %799 = vmatprep.subr.mxu1 %v556_v7  ;;  %879 = vmatprep.subr.mxu0 %v594_v11 }
  0xd8   : > { %685 = vmatmul.mubr.f32.vlgmr.msra.gmra.mxu1 %v558_v8 }
  0xd9   : > { %763 = vmatmul.mubr.f32.vlgmr.msra.gmra.mxu0 %v599_v10  ;;  %801 = vmatpush1.xpose.msra.mxu1 %v558_v8 }
  0xda   : > { %837 = vmatprep.mubr.f32.mxu1 %v594_v11  ;;  %883 = vmatpush1.xpose.msra.mxu0 %v600_v12 }
  0xdb   : > { %917 = vmatprep.mubr.f32.mxu0 %v556_v7  ;;  %955 = vmatprep.subr.mxu1 %v556_v7 }
  0xdc   : > { %841 = vmatmul.mubr.f32.vlgmr.msra.gmra.mxu1 %v600_v12 }
  0xdd   : > { %919 = vmatmul.mubr.f32.vlgmr.msra.gmra.mxu0 %v558_v8  ;;  %957 = vmatpush1.xpose.msra.mxu1 %v558_v8 }
  0xde   : > { %991 = vmatprep.mubr.f32.mxu1 %v556_v7 }
  0xe0   : > { %993 = vmatmul.mubr.f32.vlgmr.msra.gmra.mxu1 %v558_v8 }
  0xe1   : > { %1256 = shalt.err (!%p1253_p3)
}
  0xe2   : > { %s1257_s26 = scalar_lea.hbm %s1022_s13, 256  ;;  %s1261_s8 = scalar_lea.hbm %s1629_s3, 512 }
  0xe3   : > { %p1258_p4 = scmp.ne.s32.totalorder %s1022_s13, %s1257_s26  ;;  %p1262_p9 = scmp.lt.s32.totalorder %s1022_s13, %s1629_s3 }
  0xe4   : > { %p1263_p10 = scmp.lt.s32.totalorder %s1261_s8, %s1257_s26 }
  0xe5   : > { %p1259_p7 = pnand %p1258_p4, %p1414_p5 }
  0xe6   : > { %p1264_p11 = por %p1263_p10, %p1262_p9 }
  0xe7   : > { %p1260_p8 = pneg %p1259_p7 }
  0xe9   : > { %p1265_p12 = pnand %p1264_p11, %p1260_p8 }
  0xeb   : > { %1268 = shalt.err (!%p1265_p12)
}
  0xec   : > { %1188 = dma.vmem_to_hbm [thread:$0]  (%p1414_p5), %s1025_s14, 256, %s1022_s13, %s1001_s15   ;;  %vm524_vm8 = vcmask 7168   ;;  %vm998_vm9 = vcmask 64512  }
  0xed   : > { %s1163_s12 = sshll.u32 %s1432_s9, 3  ;;  %s1160_s25 = sshll.u32 %s1552_s6, 3 }
  0xee   : > { %s243_s23 = scalar_lea.vmem %s1630_s4, %s1163_s12  ;;  %s1183_s9 = sshll.u32 %s1397_s22, 7 }
  0xef   : > { %s234_s13 = scalar_lea.vmem [#allocation4], %s1160_s25  ;;  %s1590_s30 = scalar_lea.hbm %s1631_s5, %s1183_s9 }
  0xf0   : > { %s1040_s14 = sshll.u32 %s234_s13, 4  ;;  %s1010_s7 = scalar_lea.sflag [#allocation5], %s1552_s6  ;;  %s1041_s14 = int_to_ptr.vmem [resolvable:$true] %s1040_s14 }
  0xf1   : > { %s1269_s8 = scalar_lea.vmem %s1041_s14, 128  ;;  %s1345_s22 = smov [#allocation4]  }
  0xf2   : > { %p1270_p13 = scmp.ne.s32.totalorder %s1041_s14, %s1269_s8  ;;  %s1273_s10 = sshll.u32 %s1345_s22, 4  ;;  %s1274_s10 = int_to_ptr.vmem [resolvable:$false] %s1273_s10 }
  0xf3   : > { %s1275_s11 = scalar_lea.vmem %s1274_s10, 256  ;;  %p1276_p2 = scmp.lt.s32.totalorder %s1041_s14, %s1274_s10 }
  0xf4   : > { %p1271_p0 = pnand %p1270_p13, %p1414_p5  ;;  %p1277_p3 = scmp.lt.s32.totalorder %s1275_s11, %s1269_s8 }
  0xf6   : > { %p1272_p1 = pneg %p1271_p0  ;;  %p1278_p4 = por %p1277_p3, %p1276_p2 }
  0xf8   : > { %p1279_p7 = pnand %p1278_p4, %p1272_p1 }
 0x156   : > { %v523_v15 = vpop.xlane.xlu1 %522 }
 0x157   : > { %525 = vst.msk [vmem:[%s243_s23] sm:$0xff] %vm524_vm8, %v523_v15 }
 0x195   : > { %v604_v16 = vpop.f32.mrf.mxu0 }
 0x197   : > { %v606_v17 = vpop.f32.mrf.mxu0 }
 0x198   : > { %v686_v18 = vpop.f32.mrf.mxu1 }
 0x199   : > { %v687_v19 = vadd.f32 %v686_v18, %v604_v16  ;;  %v764_v20 = vpop.f32.mrf.mxu0 }
 0x19a   : > { %v688_v21 = vpop.f32.mrf.mxu1 }
 0x19b   : > { %v765_v22 = vadd.f32 %v764_v20, %v687_v19  ;;  %v766_v24 = vpop.f32.mrf.mxu0 }
 0x19c   : > { %v842_v26 = vpop.f32.mrf.mxu1 }
 0x19d   : > { %v843_v27 = vadd.f32 %v842_v26, %v765_v22  ;;  %v920_v28 = vpop.f32.mrf.mxu0 }
 0x19e   : > { %v844_v31 = vpop.f32.mrf.mxu1 }
 0x19f   : > { %v921_v32 = vadd.f32 %v920_v28, %v843_v27  ;;  %v922_v33 = vpop.f32.mrf.mxu0 }
 0x1a0   : > { %v994_v34 = vpop.f32.mrf.mxu1 }
 0x1a1   : > { %v995_v36 = vadd.f32 %v994_v34, %v921_v32 }
 0x1a2   : > { %v996_v25 = vpop.f32.mrf.mxu1 }
 0x1a3   : > { %999 = vst.msk [vmem:[%s234_s13] sm:$0xff] %vm998_vm9, %v995_v36 }
 0x1a4   : > { %1282 = shalt.err (!%p1279_p7)
}
 0x1a5   : > { %s1283_s12 = scalar_lea.hbm %s1590_s30, 128  ;;  %s1287_s17 = scalar_lea.hbm %s1631_s5, 256 }
 0x1a6   : > { %p1284_p8 = scmp.ne.s32.totalorder %s1590_s30, %s1283_s12  ;;  %p1288_p11 = scmp.lt.s32.totalorder %s1590_s30, %s1631_s5 }
 0x1a7   : > { %p1289_p12 = scmp.lt.s32.totalorder %s1287_s17, %s1283_s12 }
 0x1a8   : > { %p1285_p9 = pnand %p1284_p8, %p1414_p5 }
 0x1a9   : > { %p1290_p13 = por %p1289_p12, %p1288_p11 }
 0x1aa   : > { %p1286_p10 = pneg %p1285_p9 }
 0x1ac   : > { %p1291_p0 = pnand %p1290_p13, %p1286_p10 }
 0x1ae   : > { %1294 = shalt.err (!%p1291_p0)
}
 0x1af   : > { %1189 = dma.vmem_to_hbm [thread:$0]  (%p1414_p5), %s1041_s14, 128, %s1590_s30, %s1010_s7  }
 0x1b0 PF: > { %p1199_p1 = scmp.ge.s32.totalorder %s1333_s21, 2  ;;  %s1052_s9 = sand.u32 1, %s1321_s18  }
 0x1b1   : > { %s1053_s13 = scalar_lea.sflag [#allocation3], %s1052_s9 }
 0x1b2   : > { %p1193_p2 = pnand %p1199_p1, %p1418_p6 }
 0x1b4   : > { %p1194_p3 = pneg %p1193_p2 }
 0x1b6   : > { %1312 = dma.done.wait (%p1194_p3), %s1053_s13, 256  }
 0x1b7   : > { %1314 = vsyncadd (%p1194_p3), %s1053_s13, 4294967040  ;;  %s1069_s15 = scalar_lea.sflag [#allocation5], %s1052_s9 }
 0x1b8   : > { %1316 = dma.done.wait (%p1194_p3), %s1069_s15, 128  }
 0x1b9   : > { %1318 = vsyncadd (%p1194_p3), %s1069_s15, 4294967168  ;;  %p19_p5 = scmp.ge.s32.totalorder %s1401_s24, 4   ;;  %s1634_s18 = smov %s1325_s19 }
 0x1ba   : > { %s1635_s19 = smov %s1329_s20  ;;  %s1636_s20 = smov %s1412_s27 }
 0x1bb   : > { %s1637_s21 = smov %s1401_s24  ;;  %21 = sbr.rel (!%p19_p5) target bundleno = 5 (0x5), region = 111 }
 0x1c0   :  { %1074 = vsyncpa [#allocation3], 1 }
 0x1c1   :  { %1076 = vsyncpa [#allocation3 + $0x1], 1 }
 0x1c2   :  { %1077 = vsyncpa [#allocation5], 1 }
 0x1c3   :  { %1079 = vsyncpa [#allocation5 + $0x1], 1 }

</bundles_post_ra>
